<compile_context>
chip_gen: v5e
topology: v5e:2x2
jax: 0.10.0
libtpu: 0.0.40
codegen_flags: <defaults>
</compile_context>

<pallas_src>
import functools
import math

import jax
import jax.numpy as jnp
from jax.experimental import pallas as pl
from jax.experimental.pallas import tpu as pltpu


# --------------------------------------------------------------------------
# Kernel A: dense tiled matmul (fused QKV projection)
# --------------------------------------------------------------------------
def _matmul_kernel(x_ref, w_ref, o_ref, acc_ref):
    @pl.when(pl.program_id(2) == 0)
    def _():
        acc_ref[...] = jnp.zeros_like(acc_ref)

    acc_ref[...] += jnp.dot(x_ref[...], w_ref[...],
                            preferred_element_type=jnp.float32)

    @pl.when(pl.program_id(2) == pl.num_programs(2) - 1)
    def _():
        o_ref[...] = acc_ref[...].astype(o_ref.dtype)


def _pick_tile(dim, prefs):
    """Largest preferred tile that divides `dim`, else the full dim."""
    for p in prefs:
        if dim >= p and dim % p == 0:
            return p
    return dim


def _pallas_matmul(x2d, w, out_dtype):
    M, K = x2d.shape
    K2, N = w.shape
    assert K == K2
    tm = _pick_tile(M, (256, 128, 64, 32, 16, 8))
    tn = _pick_tile(N, (256, 128))
    tk = _pick_tile(K, (512, 256, 128))
    grid = (M // tm, N // tn, K // tk)

    flops = 2 * M * N * K
    bytes_accessed = (M * K + K * N) * 2 + M * N * 2  # bf16 in / bf16 out

    return pl.pallas_call(
        _matmul_kernel,
        out_shape=jax.ShapeDtypeStruct((M, N), out_dtype),
        grid_spec=pltpu.PrefetchScalarGridSpec(
            num_scalar_prefetch=0,
            grid=grid,
            in_specs=[
                pl.BlockSpec((tm, tk), lambda i, j, k: (i, k)),
                pl.BlockSpec((tk, tn), lambda i, j, k: (k, j)),
            ],
            out_specs=pl.BlockSpec((tm, tn), lambda i, j, k: (i, j)),
            scratch_shapes=[pltpu.VMEM((tm, tn), jnp.float32)],
        ),
        compiler_params=pltpu.CompilerParams(
            dimension_semantics=("parallel", "parallel", "arbitrary")),
        cost_estimate=pl.CostEstimate(flops=int(flops), transcendentals=0,
                                      bytes_accessed=int(bytes_accessed)),
    )(x2d, w)


# --------------------------------------------------------------------------
# Kernel B: flash attention (head-grouped) + fused output projection / bias
# --------------------------------------------------------------------------
def _flash_kernel(q_ref, k_ref, v_ref, wo_ref, b_ref, o_ref,
                  m_sc, l_sc, acc_sc, *, compute_dtype, head_group):
    hb = pl.program_id(2)
    kv = pl.program_id(3)
    n_kv = pl.num_programs(3)

    # First step for this (batch, q-tile) output block: seed it with the bias.
    @pl.when((hb == 0) & (kv == 0))
    def _():
        o_ref[0] = jnp.broadcast_to(b_ref[...],
                                    o_ref.shape[1:]).astype(o_ref.dtype)

    # New head group: reset the online-softmax state.
    @pl.when(kv == 0)
    def _():
        m_sc[...] = jnp.full_like(m_sc, -jnp.inf)
        l_sc[...] = jnp.zeros_like(l_sc)
        acc_sc[...] = jnp.zeros_like(acc_sc)

    q = q_ref[0]            # (G, tq, hd)  bf16, softmax scale pre-folded
    k = k_ref[0]            # (G, tkv, hd) bf16
    v = v_ref[0]            # (G, tkv, hd) bf16

    # Scores for all heads of the group, contracting hd (no transpose).
    s = jnp.einsum('gqd,gkd->gqk', q, k,
                   preferred_element_type=jnp.float32)       # (G, tq, tkv) f32

    # Online (streaming) softmax update in f32.
    m_prev = m_sc[...]
    m_new = jnp.maximum(m_prev, s.max(axis=-1, keepdims=True))
    alpha = jnp.exp(m_prev - m_new)
    # NOTE: on v6e/v7x the exp below could run in bf16 (2x EUP rate) if the
    # bundle shows the EUP saturating; kept in f32 for accuracy / v5e.
    p = jnp.exp(s - m_new)
    l_sc[...] = alpha * l_sc[...] + p.sum(axis=-1, keepdims=True)
    acc_sc[...] = alpha * acc_sc[...] + jnp.einsum(
        'gqk,gkd->gqd', p.astype(compute_dtype), v,
        preferred_element_type=jnp.float32)
    m_sc[...] = m_new

    # End of this head group: normalize and fold straight into the output
    # projection accumulator (the resident f32 output block).
    @pl.when(kv == n_kv - 1)
    def _():
        attn = (acc_sc[...] * pl.reciprocal(l_sc[...], approx=True)
                ).astype(compute_dtype)                      # (G, tq, hd)
        contrib = jnp.zeros(o_ref.shape[1:], jnp.float32)    # (tq, D)
        for g in range(head_group):                          # static unroll
            contrib = contrib + jnp.dot(attn[g], wo_ref[g],
                                        preferred_element_type=jnp.float32)
        o_ref[0] = o_ref[0] + contrib.astype(o_ref.dtype)


def _pick_seq_tile(L, pref):
    t = min(pref, L)
    while t > 8 and L % t:
        t //= 2
    if L % t:
        t = L
    return t


def _pick_head_group(H, hd, tq, tkv):
    # Batch heads per grid step: amortizes per-step overhead and makes the
    # scratch lane-dense, but keep the f32 (G, tq, tkv) score tile <=256 KiB.
    best = 1
    for g in range(1, H + 1):
        if H % g:
            continue
        if g * hd <= 256 and g * tq * tkv * 4 <= 256 * 1024:
            best = g
    return best


def mem_efficient_mha(x, w_qkv, w_out, b_out, *, num_heads,
                      q_block=256, kv_block=128,
                      compute_dtype=jnp.bfloat16):
    """Forward of MemoryEfficientMultiHeadAttention (eval mode, mask=None).

    x:      (B, L, D) float32
    w_qkv:  (3D, D)   qkv_proj weight, PyTorch (out, in) layout, no bias
    w_out:  (D, D)    out_proj weight
    b_out:  (D,)      out_proj bias
    returns (y, None) with y of shape (B, L, D), dtype of x.
    """
    B, L, D = x.shape
    H = num_heads
    assert D % H == 0, "embed_dim must be divisible by num_heads"
    hd = D // H
    scale = hd ** -0.5

    # -------- Kernel A: fused QKV projection, done once for all tiles ------
    w_qkv_t = w_qkv.T.astype(jnp.float32)                     # (D, 3D) in->out
    col_scale = jnp.concatenate([jnp.full((D,), scale, jnp.float32),
                                 jnp.ones((2 * D,), jnp.float32)])
    w_qkv_t = (w_qkv_t * col_scale[None, :]).astype(compute_dtype)
    x2d = x.reshape(B * L, D).astype(compute_dtype)
    qkv2d = _pallas_matmul(x2d, w_qkv_t, compute_dtype)        # (B*L, 3D)

    # One-time layout plumbing: split per head -> (B, H, L, hd).
    qkv = qkv2d.reshape(B, L, 3, H, hd)
    q = jnp.transpose(qkv[:, :, 0], (0, 2, 1, 3))
    k = jnp.transpose(qkv[:, :, 1], (0, 2, 1, 3))
    v = jnp.transpose(qkv[:, :, 2], (0, 2, 1, 3))

    # Per-head slabs of the output projection: y += attn_h @ w_out.T[h]
    wo_h = w_out.T.reshape(H, hd, D).astype(compute_dtype)     # (H, hd, D)
    b2d = b_out.reshape(1, D).astype(jnp.float32)

    # -------- Kernel B: flash attention + fused out projection -------------
    tq = _pick_seq_tile(L, q_block)
    tkv = _pick_seq_tile(L, kv_block)
    G = _pick_head_group(H, hd, tq, tkv)
    grid = (B, L // tq, H // G, L // tkv)

    # VMEM budget derived from the actual tile footprint (double-buffered,
    # x2 headroom), capped below v7x's 64 MiB physical VMEM.
    per_step = (G * tq * hd * 2            # q block (bf16)
                + 2 * G * tkv * hd * 2     # k, v blocks
                + G * hd * D * 2           # wo block
                + D * 4                    # bias
                + tq * D * 4)              # resident output block (f32)
    scratch_bytes = G * tq * (hd + 2) * 4
    vmem_limit = int(min(56 * 1024 * 1024,
                         max(16 * 1024 * 1024, 4 * per_step + 2 * scratch_bytes)))

    flops = 4 * B * H * L * L * hd + 2 * B * L * D * D
    transcendentals = B * H * L * L
    bytes_accessed = (B * H * L * hd * 2 * (1 + 2 * (L // tq))   # q + re-read k/v
                      + B * (L // tq) * H * hd * D * 2           # wo re-fetch
                      + B * L * D * 4)                           # output

    kernel = functools.partial(_flash_kernel,
                               compute_dtype=compute_dtype, head_group=G)

    y = pl.pallas_call(
        kernel,
        out_shape=jax.ShapeDtypeStruct((B, L, D), x.dtype),
        grid_spec=pltpu.PrefetchScalarGridSpec(
            num_scalar_prefetch=0,
            grid=grid,
            in_specs=[
                pl.BlockSpec((1, G, tq, hd),
                             lambda b, qi, hb, kv: (b, hb, qi, 0)),
                pl.BlockSpec((1, G, tkv, hd),
                             lambda b, qi, hb, kv: (b, hb, kv, 0)),
                pl.BlockSpec((1, G, tkv, hd),
                             lambda b, qi, hb, kv: (b, hb, kv, 0)),
                pl.BlockSpec((G, hd, D),
                             lambda b, qi, hb, kv: (hb, 0, 0)),
                pl.BlockSpec((1, D),
                             lambda b, qi, hb, kv: (0, 0)),
            ],
            out_specs=pl.BlockSpec((1, tq, D),
                                   lambda b, qi, hb, kv: (b, qi, 0)),
            scratch_shapes=[
                pltpu.VMEM((G, tq, 1), jnp.float32),   # running row max
                pltpu.VMEM((G, tq, 1), jnp.float32),   # running denominator
                pltpu.VMEM((G, tq, hd), jnp.float32),  # attention numerator
            ],
        ),
        compiler_params=pltpu.CompilerParams(
            dimension_semantics=("parallel", "parallel",
                                 "arbitrary", "arbitrary"),
            vmem_limit_bytes=vmem_limit,
        ),
        cost_estimate=pl.CostEstimate(flops=int(flops),
                                      transcendentals=int(transcendentals),
                                      bytes_accessed=int(bytes_accessed)),
    )(q, k, v, wo_h, b2d)
    return y, None


# --------------------------------------------------------------------------
# Pure-JAX f32 reference mirroring the PyTorch forward (eval, mask=None).
# --------------------------------------------------------------------------
def _reference(x, w_qkv, w_out, b_out, *, num_heads):
    B, L, D = x.shape
    hd = D // num_heads
    scale = hd ** -0.5
    qkv = x @ w_qkv.T                               # (B, L, 3D)
    qkv = qkv.reshape(B, L, 3, num_heads, hd)
    qkv = jnp.transpose(qkv, (2, 0, 3, 1, 4))       # (3, B, H, L, hd)
    q, k, v = qkv[0], qkv[1], qkv[2]
    s = jnp.einsum("bhqd,bhkd->bhqk", q, k) * scale
    p = jax.nn.softmax(s.astype(jnp.float32), axis=-1).astype(s.dtype)
    o = jnp.einsum("bhqk,bhkd->bhqd", p, v)         # (B, H, L, hd)
    o = jnp.transpose(o, (0, 2, 1, 3)).reshape(B, L, D)
    return o @ w_out.T + b_out


if __name__ == "__main__":
    # Small shapes consistent with the module: batch=2, seq=8, embed_dim=32, heads=4
    B, L, D, H = 2, 8, 32, 4

    key = jax.random.PRNGKey(0)
    kx, kqkv, kw, kb = jax.random.split(key, 4)

    x = jax.random.normal(kx, (B, L, D), dtype=jnp.float32)
    bound = 1.0 / math.sqrt(D)
    w_qkv = jax.random.uniform(kqkv, (3 * D, D), jnp.float32, -bound, bound)
    w_out = jax.random.uniform(kw, (D, D), jnp.float32, -bound, bound)
    b_out = jax.random.uniform(kb, (D,), jnp.float32, -bound, bound)

    y, attn_weights = mem_efficient_mha(x, w_qkv, w_out, b_out, num_heads=H)
    y = jax.block_until_ready(y)

    y_ref = _reference(x, w_qkv, w_out, b_out, num_heads=H)
    assert y.shape == (B, L, D)
    assert attn_weights is None
    # bf16 matmul operands with f32 accumulation -> compare at bf16 tolerance.
    assert jnp.allclose(y, y_ref, rtol=2e-2, atol=2e-2), "mismatch vs reference"

    print("KERNEL_OK")
</pallas_src>

<mosaic_0001>
module attributes {stable_mosaic.version = 11 : i64} {
  func.func @_matmul_kernel(%arg0: i32, %arg1: i32, %arg2: i32, %arg3: memref<16x32xbf16, #tpu.memory_space<vmem>>, %arg4: memref<32x96xbf16, #tpu.memory_space<vmem>>, %arg5: memref<16x96xbf16, #tpu.memory_space<vmem>>, %arg6: memref<16x96xf32, #tpu.memory_space<vmem>>) attributes {dimension_semantics = [#tpu.dimension_semantics<parallel>, #tpu.dimension_semantics<parallel>, #tpu.dimension_semantics<arbitrary>], iteration_bounds = array<i64: 1, 1, 1>, scalar_prefetch = 0 : i64, scratch_operands = 1 : i64, tpu.core_type = #tpu.core_type<tc>, window_params = [{transform_indices = @transform_0, window_bounds = array<i64: 16, 32>}, {transform_indices = @transform_1, window_bounds = array<i64: 32, 96>}, {transform_indices = @transform_2, window_bounds = array<i64: 16, 96>}]} {
    %c0_i32 = arith.constant 0 : i32
    %0 = arith.cmpi eq, %arg2, %c0_i32 : i32
    %1 = arith.extui %0 : i1 to i32
    %c0_i32_0 = arith.constant 0 : i32
    %2 = arith.cmpi ne, %1, %c0_i32_0 : i32
    scf.if %2 {
      %cst_10 = arith.constant 0.000000e+00 : f32
      %12 = vector.broadcast %cst_10 : f32 to vector<16x96xf32>
      %c0_11 = arith.constant 0 : index
      %c0_12 = arith.constant 0 : index
      %13 = vector.load %arg6[%c0_11, %c0_12] : memref<16x96xf32, #tpu.memory_space<vmem>>, vector<16x96xf32>
      tpu.vector_store %arg6[%c0_11, %c0_12], %12 {strides = array<i32>} : memref<16x96xf32, #tpu.memory_space<vmem>>, vector<16x96xf32>,
    } else {
    }
    %c0 = arith.constant 0 : index
    %c0_1 = arith.constant 0 : index
    %3 = vector.load %arg6[%c0, %c0_1] : memref<16x96xf32, #tpu.memory_space<vmem>>, vector<16x96xf32>
    %c0_2 = arith.constant 0 : index
    %c0_3 = arith.constant 0 : index
    %4 = vector.load %arg3[%c0_2, %c0_3] : memref<16x32xbf16, #tpu.memory_space<vmem>>, vector<16x32xbf16>
    %c0_4 = arith.constant 0 : index
    %c0_5 = arith.constant 0 : index
    %5 = vector.load %arg4[%c0_4, %c0_5] : memref<32x96xbf16, #tpu.memory_space<vmem>>, vector<32x96xbf16>
    %cst = arith.constant dense<0.000000e+00> : vector<16x96xf32>
    %6 = tpu.matmul %4, %5, %cst {dimension_numbers = #tpu.dot_dimension_numbers<[1], [0], [0], [1], [0, 0, 1, 1], [], []>} : vector<16x32xbf16>, vector<32x96xbf16>, vector<16x96xf32> -> vector<16x96xf32>
    %7 = arith.addf %3, %6 : vector<16x96xf32>
    %c0_6 = arith.constant 0 : index
    %c0_7 = arith.constant 0 : index
    %8 = vector.load %arg6[%c0_6, %c0_7] : memref<16x96xf32, #tpu.memory_space<vmem>>, vector<16x96xf32>
    tpu.vector_store %arg6[%c0_6, %c0_7], %7 {strides = array<i32>} : memref<16x96xf32, #tpu.memory_space<vmem>>, vector<16x96xf32>,
    %c0_i32_8 = arith.constant 0 : i32
    %9 = arith.cmpi eq, %arg2, %c0_i32_8 : i32
    %10 = arith.extui %9 : i1 to i32
    %c0_i32_9 = arith.constant 0 : i32
    %11 = arith.cmpi ne, %10, %c0_i32_9 : i32
    scf.if %11 {
      %c0_10 = arith.constant 0 : index
      %c0_11 = arith.constant 0 : index
      %12 = vector.load %arg6[%c0_10, %c0_11] : memref<16x96xf32, #tpu.memory_space<vmem>>, vector<16x96xf32>
      %13 = arith.truncf %12 : vector<16x96xf32> to vector<16x96xbf16>
      %c0_12 = arith.constant 0 : index
      %c0_13 = arith.constant 0 : index
      %14 = vector.load %arg5[%c0_12, %c0_13] : memref<16x96xbf16, #tpu.memory_space<vmem>>, vector<16x96xbf16>
      tpu.vector_store %arg5[%c0_12, %c0_13], %13 {strides = array<i32>} : memref<16x96xbf16, #tpu.memory_space<vmem>>, vector<16x96xbf16>,
    } else {
    }
    return
  }
  func.func @transform_0(%arg0: i32, %arg1: i32, %arg2: i32) -> (i32, i32) {
    %c0_i32 = arith.constant 0 : i32
    return %arg0, %arg2 : i32, i32
  }
  func.func @transform_1(%arg0: i32, %arg1: i32, %arg2: i32) -> (i32, i32) {
    %c0_i32 = arith.constant 0 : i32
    return %arg2, %arg1 : i32, i32
  }
  func.func @transform_2(%arg0: i32, %arg1: i32, %arg2: i32) -> (i32, i32) {
    %c0_i32 = arith.constant 0 : i32
    return %arg0, %arg1 : i32, i32
  }
}

</mosaic_0001>

<bundles_post_ra>
// kernel: tpu_custom_call.1
= control target key start
LH: loop header
LB: loop body
LE: loop exit
PB: predicated region body
PF: predicated region fallthrough
CT: control target
= control target key end

     0   :  { %7 = vsyncpa [#allocation4], 0  ;;  %s273_s0 = inlined_call_operand.hbm [shape: bf16[16,32], index: 0, kind: input, shape index: {}]   ;;  %s274_s1 = inlined_call_operand.hbm [shape: bf16[32,96], index: 1, kind: input, shape index: {}]   ;;  %s275_s2 = inlined_call_operand.hbm [shape: bf16[16,96], index: 2, kind: output, shape index: {}]  }
   0x1   :  { %8 = vsyncpa [#allocation7], 0 }
   0x2   :  { %9 = vsyncpa [#allocation5], 0  ;;  %s14_s11 = sshll.u32 %s273_s0, 4  ;;  %s230_s12 = smov [#allocation3]   ;;  %s15_s11 = int_to_ptr.hbm [resolvable:$true] %s14_s11 }
   0x3   :  { %s16_s13 = sshll.u32 %s230_s12, 4  ;;  %s27_s16 = sshll.u32 %s274_s1, 4  ;;  %s17_s13 = int_to_ptr.vmem [resolvable:$true] %s16_s13  ;;  %s28_s16 = int_to_ptr.hbm [resolvable:$true] %s27_s16 }
   0x4   :  { %s231_s17 = smov 64   ;;  %s232_s18 = smov 4  }
   0x5   :  { %22 = dma.hbm_to_vmem [thread:$0]  %s15_s11, 128, %s17_s13, [#allocation4], %s231_s17, %s231_s17, %s232_s18  }
   0x6   :  { %s233_s19 = smov [#allocation6]  }
   0x7   :  { %s29_s20 = sshll.u32 %s233_s19, 4  ;;  %s30_s20 = int_to_ptr.vmem [resolvable:$true] %s29_s20 }
   0x8   :  { %35 = dma.hbm_to_vmem [thread:$0]  %s28_s16, 256, %s30_s20, [#allocation7], %s231_s17, %s231_s17, %s232_s18  }
   0x9   :  { %224 = dma.done.wait [#allocation4], 128  }
   0xa   :  { %225 = vsyncadd [#allocation4], 4294967168 }
   0xb   :  { %226 = dma.done.wait [#allocation7], 256  }
   0xc   :  { %227 = vsyncadd [#allocation7], 4294967040  ;;  %vm49_vm0 = vcmask 785408   ;;  %v234_v0 = vmov 0.0   ;;  %v145_v1 = vld [vmem:[#allocation6 + $0x8] sm:$0xff]  ;;  %v144_v2 = vld [vmem:[#allocation6] sm:$0xff] }
   0xd   :  { %50 = vst.msk [vmem:[#allocation2] sm:$0xff] %vm49_vm0, %v234_v0  ;;  %87 = vmatpush.bf16.msra.mxu0 %v145_v1  ;;  %v143_v3 = vld [vmem:[#allocation3] sm:$0xff]  ;;  %vm77_vm1 = vcmask 261120   ;;  %vm107_vm2 = vcmask 781312   ;;  %s235_s0 = smov [#allocation8]   ;;  %s116_s23 = sshll.u32 %s275_s2, 4  ;;  %s117_s23 = int_to_ptr.hbm [resolvable:$true] %s116_s23 }
   0xe   :  { %51 = vst.msk [vmem:[#allocation2 + $0x8] sm:$0xff] %vm49_vm0, %v234_v0  ;;  %s114_s1 = sshll.u32 %s235_s0, 4  ;;  %s115_s1 = int_to_ptr.vmem [resolvable:$true] %s114_s1 }
  0x11   :  { %88 = vmatpush.bf16.msra.mxu0 %v144_v2 }
  0x14   :  { %142 = vmatmul.msk.bf16.vlgmr.msra.gmra.mxu0 %vm77_vm1, %v143_v3  ;;  %v52_v4 = vld [vmem:[#allocation2] sm:$0xff] }
  0x15   :  { %v53_v7 = vld [vmem:[#allocation2 + $0x8] sm:$0xff] }
  0x91   :  { %v90_v5 = vpop.f32.mrf.mxu0 }
  0x92   :  { %v95_v6 = vadd.f32 %v90_v5, %v52_v4 }
  0x94   :  { %98 = vst.msk [vmem:[#allocation2] sm:$0xff] %vm49_vm0, %v95_v6 }
  0x99   :  { %v92_v8 = vpop.f32.mrf.mxu0 }
  0x9a   :  { %v96_v9 = vadd.f32 %v92_v8, %v53_v7 }
  0x9b   :  { %v103_v10 = vld [vmem:[#allocation2] sm:$0xff] }
  0x9c   :  { %99 = vst.msk [vmem:[#allocation2 + $0x8] sm:$0xff] %vm49_vm0, %v96_v9  ;;  %v105_v11 = vpack.c.bf16 %v103_v10, %v103_v10 }
  0x9e   :  { %108 = vst.msk [vmem:[#allocation8] sm:$0xf] %vm107_vm2, %v105_v11 }
  0xa3   :  { %v104_v12 = vld [vmem:[#allocation2 + $0x8] sm:$0xff] }
  0xa4   :  { %v106_v13 = vpack.c.bf16 %v104_v12, %v104_v12 }
  0xa6   :  { %109 = vst.msk [vmem:[#allocation8 + $0x4] sm:$0xf] %vm107_vm2, %v106_v13 }
  0xa7   :  { %122 = dma.vmem_to_hbm [thread:$0]  %s115_s1, 128, %s117_s23, [#allocation5], %s231_s17, %s231_s17, %s232_s18  }
  0xa8   :  { %228 = dma.done.wait [#allocation5], 128  }
  0xa9   :  { %229 = vsyncadd [#allocation5], 4294967168 }
  0xaa   :  { %127 = vsyncpa [#allocation4], 1 }
  0xab   :  { %128 = vsyncpa [#allocation7], 1 }
  0xac   :  { %129 = vsyncpa [#allocation5], 1 }

</bundles_post_ra>
